<compile_context>
chip_gen: v7x
topology: tpu7x:2x2x1
jax: 0.10.0
libtpu: 0.0.40
codegen_flags: <defaults>
</compile_context>

<pallas_src>
import numpy as np
import jax
import jax.numpy as jnp
from jax.experimental import pallas as pl
from jax.experimental.pallas import tpu as pltpu


def _round_up(x, m):
    return ((x + m - 1) // m) * m


# ----------------------------------------------------------------------------
# Kernel 1: fused bank of 1x1 convs  --  y = relu(X @ W + b), BN folded into W
# ----------------------------------------------------------------------------
def _matmul_bn_relu_kernel(x_ref, w_ref, b_ref, o_ref):
    # x_ref: (tm, K) bf16; w_ref: (K, Cp) bf16 (VMEM-resident);
    # b_ref: (1, Cp) f32 (resident); o_ref: (tm, Cp) bf16.
    acc = jnp.dot(x_ref[...], w_ref[...], preferred_element_type=jnp.float32)
    o_ref[...] = jnp.maximum(acc + b_ref[...], 0.0).astype(o_ref.dtype)


def pointwise_conv_bank(x_flat, w_mat, bias, *, tm=256):
    """x_flat: (M, Cin) bf16;  w_mat: (Cin, Cp) bf16;  bias: (1, Cp) f32."""
    M, K = x_flat.shape
    Cp = w_mat.shape[1]
    tm = min(tm, _round_up(M, 8))
    Mp = _round_up(M, tm)
    x_p = jnp.pad(x_flat, ((0, Mp - M), (0, 0)))

    cost = pl.CostEstimate(
        flops=2 * Mp * K * Cp,
        transcendentals=0,
        bytes_accessed=Mp * K * 2 + K * Cp * 2 + Cp * 4 + Mp * Cp * 2)

    out = pl.pallas_call(
        _matmul_bn_relu_kernel,
        out_shape=jax.ShapeDtypeStruct((Mp, Cp), jnp.bfloat16),
        grid=(Mp // tm,),
        in_specs=[
            pl.BlockSpec((tm, K), lambda i: (i, 0)),
            pl.BlockSpec((K, Cp), lambda i: (0, 0)),   # weight resident in VMEM
            pl.BlockSpec((1, Cp), lambda i: (0, 0)),   # bias resident in VMEM
        ],
        out_specs=pl.BlockSpec((tm, Cp), lambda i: (i, 0)),
        compiler_params=pltpu.CompilerParams(
            dimension_semantics=("parallel",)),
        cost_estimate=cost,
    )(x_p, w_mat, bias)
    return out[:M]


# ----------------------------------------------------------------------------
# Kernel 2: implicit-GEMM kh x kw conv + BN + ReLU (in-kernel tap accumulation)
# ----------------------------------------------------------------------------
def _make_tap_kernel(kh, kw, Wp, Mo):
    taps = [(di, dj) for di in range(kh) for dj in range(kw)]

    def kernel(x_ref, w_ref, b_ref, o_ref, acc_ref):
        # x_ref : (1, Lp, Cin) bf16 -- flattened zero-padded image (+kw-1 rows)
        # w_ref : (kh*kw, Cin, Cp) bf16 -- fully VMEM-resident
        # b_ref : (1, Cp) f32
        # o_ref : (1, Mo, Cp) bf16 with Mo = Ho*Wp (garbage cols sliced later)
        # acc   : (Mo, Cp) f32 scratch
        for t, (di, dj) in enumerate(taps):
            start = di * Wp + dj                       # static Python int
            xt = x_ref[0, pl.ds(start, Mo), :]         # contiguous tap slice
            contrib = jnp.dot(xt, w_ref[t],
                              preferred_element_type=jnp.float32)
            if t == 0:
                acc_ref[...] = contrib
            else:
                acc_ref[...] += contrib
        o_ref[0] = jnp.maximum(acc_ref[...] + b_ref[...], 0.0).astype(o_ref.dtype)

    return kernel


def conv_bn_relu(x_nhwc, w_oihw, scale, bias, *, pad):
    """BasicConv2d (stride 1) as an implicit-GEMM Pallas kernel.

    x_nhwc is bf16; weights / BN params are f32 (folded here).  Returns bf16.
    """
    Cout, Cin, kh, kw = w_oihw.shape
    N, H, W, C = x_nhwc.shape
    assert C == Cin
    Hp, Wp = H + 2 * pad, W + 2 * pad
    Ho, Wo = Hp - kh + 1, Wp - kw + 1

    # Zero-pad spatially and flatten (H, W) into one axis.  The conv is
    # computed over the padded width too, which makes every tap a contiguous
    # slice of the flat image; the garbage columns wo >= Wo are sliced away.
    xp = jnp.pad(x_nhwc, ((0, 0), (pad, pad), (pad, pad), (0, 0)))
    L = Hp * Wp
    Mo = Ho * Wp
    Lp = (kh - 1) * Wp + (kw - 1) + Mo                 # == L + kw - 1
    x_flat = jnp.pad(xp.reshape(N, L, Cin), ((0, 0), (0, Lp - L), (0, 0)))

    Cp = _round_up(Cout, 128)
    # (Cout, Cin, kh, kw) -> (kh*kw, Cin, Cout); fold BN scale; pad; bf16.
    wt = jnp.transpose(w_oihw, (2, 3, 1, 0)).reshape(kh * kw, Cin, Cout)
    wt = wt * scale.reshape(1, 1, Cout)
    wt = jnp.pad(wt, ((0, 0), (0, 0), (0, Cp - Cout))).astype(jnp.bfloat16)
    b2 = jnp.pad(bias.reshape(1, Cout).astype(jnp.float32),
                 ((0, 0), (0, Cp - Cout)))

    cost = pl.CostEstimate(
        flops=2 * N * Mo * Cin * Cp * kh * kw,
        transcendentals=0,
        bytes_accessed=(N * Lp * Cin * 2 + kh * kw * Cin * Cp * 2
                        + Cp * 4 + N * Mo * Cp * 2))

    out = pl.pallas_call(
        _make_tap_kernel(kh, kw, Wp, Mo),
        out_shape=jax.ShapeDtypeStruct((N, Mo, Cp), jnp.bfloat16),
        grid=(N,),
        in_specs=[
            pl.BlockSpec((1, Lp, Cin), lambda n: (n, 0, 0)),
            pl.BlockSpec((kh * kw, Cin, Cp), lambda n: (0, 0, 0)),  # resident
            pl.BlockSpec((1, Cp), lambda n: (0, 0)),                # resident
        ],
        out_specs=pl.BlockSpec((1, Mo, Cp), lambda n: (n, 0, 0)),
        scratch_shapes=[pltpu.VMEM((Mo, Cp), jnp.float32)],
        compiler_params=pltpu.CompilerParams(
            dimension_semantics=("parallel",)),
        cost_estimate=cost,
    )(x_flat, wt, b2)

    return out.reshape(N, Ho, Wp, Cp)[:, :, :Wo, :Cout]


# ----------------------------------------------------------------------------
# Parameter init (deterministic, synthetic) + BN folding (inference semantics)
# ----------------------------------------------------------------------------
def _init_basic_conv(key, cin, cout, kh, kw, eps=0.001):
    kw_, kg, kb, km, kv = jax.random.split(key, 5)
    fan_in = cin * kh * kw
    w = jax.random.normal(kw_, (cout, cin, kh, kw), jnp.float32) * np.sqrt(2.0 / fan_in)
    gamma = 1.0 + 0.1 * jax.random.normal(kg, (cout,), jnp.float32)
    beta = 0.1 * jax.random.normal(kb, (cout,), jnp.float32)
    run_mean = 0.1 * jax.random.normal(km, (cout,), jnp.float32)
    run_var = 1.0 + 0.1 * jax.random.uniform(kv, (cout,), jnp.float32)
    scale = gamma / jnp.sqrt(run_var + eps)
    bias = beta - run_mean * scale
    return (w, scale, bias)


def init_inception_a_params(key, in_channels, pool_features):
    ks = jax.random.split(key, 7)
    return {
        "branch1x1":      _init_basic_conv(ks[0], in_channels, 64, 1, 1),
        "branch5x5_1":    _init_basic_conv(ks[1], in_channels, 48, 1, 1),
        "branch5x5_2":    _init_basic_conv(ks[2], 48, 64, 5, 5),
        "branch3x3dbl_1": _init_basic_conv(ks[3], in_channels, 64, 1, 1),
        "branch3x3dbl_2": _init_basic_conv(ks[4], 64, 96, 3, 3),
        "branch3x3dbl_3": _init_basic_conv(ks[5], 96, 96, 3, 3),
        "branch_pool":    _init_basic_conv(ks[6], in_channels, pool_features, 1, 1),
    }


# ----------------------------------------------------------------------------
# InceptionA forward (Pallas) -- input/output NCHW like PyTorch
# ----------------------------------------------------------------------------
def inception_a_forward(x_nchw, params):
    x = jnp.transpose(x_nchw, (0, 2, 3, 1)).astype(jnp.bfloat16)   # NHWC, bf16
    N, H, W, Cin = x.shape

    # ---- Stage 1: the three 1x1 convs that read x, as ONE K=Cin matmul.
    w11, s11, b11 = params["branch1x1"]
    w51, s51, b51 = params["branch5x5_1"]
    w31, s31, b31 = params["branch3x3dbl_1"]
    c11, c51, c31 = w11.shape[0], w51.shape[0], w31.shape[0]
    c_tot = c11 + c51 + c31
    Cp = _round_up(c_tot, 128)                                      # 256-wide

    def _cols(w, s):          # (Cout, Cin, 1, 1) -> (Cin, Cout), BN-scaled
        return w[:, :, 0, 0].T * s.reshape(1, -1)

    w_cat = jnp.concatenate([_cols(w11, s11), _cols(w51, s51), _cols(w31, s31)],
                            axis=1)
    w_cat = jnp.pad(w_cat, ((0, 0), (0, Cp - c_tot))).astype(jnp.bfloat16)
    b_cat = jnp.pad(jnp.concatenate([b11, b51, b31]).reshape(1, c_tot)
                    .astype(jnp.float32), ((0, 0), (0, Cp - c_tot)))

    stage1 = pointwise_conv_bank(x.reshape(N * H * W, Cin), w_cat, b_cat, tm=256)
    branch1x1    = stage1[:, :c11].reshape(N, H, W, c11)
    branch5x5    = stage1[:, c11:c11 + c51].reshape(N, H, W, c51)
    branch3x3dbl = stage1[:, c11 + c51:c_tot].reshape(N, H, W, c31)

    # ---- branch_pool: F.avg_pool2d(3, s=1, p=1, count_include_pad=True)
    #      followed by a 1x1 conv == a single 3x3 conv with all taps = w/9.
    wbp, sbp, bbp = params["branch_pool"]
    wbp3 = jnp.broadcast_to(wbp / 9.0, wbp.shape[:2] + (3, 3))
    branch_pool = conv_bn_relu(x, wbp3, sbp, bbp, pad=1)

    # ---- Stage 2 / 3: real 5x5 and 3x3 convs, implicit GEMM.
    w, s, b = params["branch5x5_2"]
    branch5x5 = conv_bn_relu(branch5x5, w, s, b, pad=2)
    w, s, b = params["branch3x3dbl_2"]
    branch3x3dbl = conv_bn_relu(branch3x3dbl, w, s, b, pad=1)
    w, s, b = params["branch3x3dbl_3"]
    branch3x3dbl = conv_bn_relu(branch3x3dbl, w, s, b, pad=1)

    # TODO(synk): writing each branch into a 128-aligned channel slice of one
    # shared output slab (out_specs offsets + input_output_aliases) would drop
    # this concat copy; the branch widths (64/64/96/pool) are not all
    # 128-divisible, so the concat is left as XLA glue.
    out_nhwc = jnp.concatenate(
        [branch1x1, branch5x5, branch3x3dbl, branch_pool], axis=-1)
    return jnp.transpose(out_nhwc, (0, 3, 1, 2)).astype(jnp.float32)  # NCHW


# ----------------------------------------------------------------------------
# Pure-JAX reference (for correctness check)
# ----------------------------------------------------------------------------
def _ref_basic_conv(x_nchw, w, scale, bias, stride, pad):
    y = jax.lax.conv_general_dilated(
        x_nchw, w, (stride, stride), [(pad, pad), (pad, pad)],
        dimension_numbers=("NCHW", "OIHW", "NCHW"))
    y = y * scale[None, :, None, None] + bias[None, :, None, None]
    return jnp.maximum(y, 0.0)


def _ref_avg_pool_3x3_s1_p1(x_nchw):
    # PyTorch F.avg_pool2d default count_include_pad=True -> always divide by 9.
    s = jax.lax.reduce_window(
        x_nchw, 0.0, jax.lax.add,
        window_dimensions=(1, 1, 3, 3), window_strides=(1, 1, 1, 1),
        padding=((0, 0), (0, 0), (1, 1), (1, 1)))
    return s / 9.0


def ref_inception_a(x_nchw, params):
    b1 = _ref_basic_conv(x_nchw, *params["branch1x1"], 1, 0)
    b5 = _ref_basic_conv(x_nchw, *params["branch5x5_1"], 1, 0)
    b5 = _ref_basic_conv(b5, *params["branch5x5_2"], 1, 2)
    b3 = _ref_basic_conv(x_nchw, *params["branch3x3dbl_1"], 1, 0)
    b3 = _ref_basic_conv(b3, *params["branch3x3dbl_2"], 1, 1)
    b3 = _ref_basic_conv(b3, *params["branch3x3dbl_3"], 1, 1)
    bp = _ref_avg_pool_3x3_s1_p1(x_nchw)
    bp = _ref_basic_conv(bp, *params["branch_pool"], 1, 0)
    return jnp.concatenate([b1, b5, b3, bp], axis=1)


# ----------------------------------------------------------------------------
if __name__ == "__main__":
    N, C, H, W = 2, 4, 16, 16
    POOL_FEATURES = 32
    x = jax.random.normal(jax.random.PRNGKey(0), (N, C, H, W), jnp.float32)
    params = init_inception_a_params(jax.random.PRNGKey(42), C, POOL_FEATURES)

    out = jax.block_until_ready(inception_a_forward(x, params))
    assert out.shape == (N, 64 + 64 + 96 + POOL_FEATURES, H, W), out.shape

    ref = ref_inception_a(x, params)
    # bf16 activations/weights end-to-end (f32 accumulation) across three
    # chained convs -> tolerance accounts for bf16 rounding of intermediates.
    np.testing.assert_allclose(np.asarray(out), np.asarray(ref),
                               rtol=5e-2, atol=5e-2)
    print("KERNEL_OK")
</pallas_src>

<mosaic_0001>
module attributes {stable_mosaic.version = 11 : i64} {
  func.func @_matmul_bn_relu_kernel(%arg0: i32, %arg1: memref<256x4xbf16, #tpu.memory_space<vmem>>, %arg2: memref<4x256xbf16, #tpu.memory_space<vmem>>, %arg3: memref<1x256xf32, #tpu.memory_space<vmem>>, %arg4: memref<256x256xbf16, #tpu.memory_space<vmem>>) attributes {dimension_semantics = [#tpu.dimension_semantics<parallel>], iteration_bounds = array<i64: 2>, scalar_prefetch = 0 : i64, scratch_operands = 0 : i64, tpu.core_type = #tpu.core_type<tc>, window_params = [{transform_indices = @transform_0, window_bounds = array<i64: 256, 4>}, {pipeline_mode = #tpu.pipeline_mode<synchronous>, transform_indices = @transform_1, window_bounds = array<i64: 4, 256>}, {pipeline_mode = #tpu.pipeline_mode<synchronous>, transform_indices = @transform_2, window_bounds = array<i64: 1, 256>}, {transform_indices = @transform_3, window_bounds = array<i64: 256, 256>}]} {
    %c0 = arith.constant 0 : index
    %c0_0 = arith.constant 0 : index
    %0 = vector.load %arg1[%c0, %c0_0] : memref<256x4xbf16, #tpu.memory_space<vmem>>, vector<256x4xbf16>
    %c0_1 = arith.constant 0 : index
    %c0_2 = arith.constant 0 : index
    %1 = vector.load %arg2[%c0_1, %c0_2] : memref<4x256xbf16, #tpu.memory_space<vmem>>, vector<4x256xbf16>
    %cst = arith.constant dense<0.000000e+00> : vector<256x256xf32>
    %2 = tpu.matmul %0, %1, %cst {dimension_numbers = #tpu.dot_dimension_numbers<[1], [0], [0], [1], [0, 0, 1, 1], [], []>} : vector<256x4xbf16>, vector<4x256xbf16>, vector<256x256xf32> -> vector<256x256xf32>
    %c0_3 = arith.constant 0 : index
    %c0_4 = arith.constant 0 : index
    %3 = vector.load %arg3[%c0_3, %c0_4] : memref<1x256xf32, #tpu.memory_space<vmem>>, vector<1x256xf32>
    %4 = vector.broadcast %3 : vector<1x256xf32> to vector<256x256xf32>
    %5 = arith.addf %2, %4 : vector<256x256xf32>
    %cst_5 = arith.constant 0.000000e+00 : f32
    %6 = vector.broadcast %cst_5 : f32 to vector<256x256xf32>
    %7 = arith.maximumf %5, %6 : vector<256x256xf32>
    %8 = arith.truncf %7 : vector<256x256xf32> to vector<256x256xbf16>
    %c0_6 = arith.constant 0 : index
    %c0_7 = arith.constant 0 : index
    %9 = vector.load %arg4[%c0_6, %c0_7] : memref<256x256xbf16, #tpu.memory_space<vmem>>, vector<256x256xbf16>
    tpu.vector_store %arg4[%c0_6, %c0_7], %8 {strides = array<i32>} : memref<256x256xbf16, #tpu.memory_space<vmem>>, vector<256x256xbf16>,
    return
  }
  func.func @transform_0(%arg0: i32) -> (i32, i32) {
    %c0_i32 = arith.constant 0 : i32
    %c0_i32_0 = arith.constant 0 : i32
    return %arg0, %c0_i32 : i32, i32
  }
  func.func @transform_1(%arg0: i32) -> (i32, i32) {
    %c0_i32 = arith.constant 0 : i32
    %c0_i32_0 = arith.constant 0 : i32
    %c0_i32_1 = arith.constant 0 : i32
    return %c0_i32, %c0_i32_0 : i32, i32
  }
  func.func @transform_2(%arg0: i32) -> (i32, i32) {
    %c0_i32 = arith.constant 0 : i32
    %c0_i32_0 = arith.constant 0 : i32
    %c0_i32_1 = arith.constant 0 : i32
    return %c0_i32, %c0_i32_0 : i32, i32
  }
  func.func @transform_3(%arg0: i32) -> (i32, i32) {
    %c0_i32 = arith.constant 0 : i32
    %c0_i32_0 = arith.constant 0 : i32
    return %arg0, %c0_i32 : i32, i32
  }
}

</mosaic_0001>

<bundles_post_ra>
// kernel: tpu_custom_call.1
= control target key start
LH: loop header
LB: loop body
LE: loop exit
PB: predicated region body
PF: predicated region fallthrough
CT: control target
= control target key end

     0   :  { %8 = vsyncpa [#allocation3], 0  ;;  %s1431_s0 = inlined_call_operand.vmem [shape: bf16[512,4], index: 0, kind: input, shape index: {}]   ;;  %s1432_s1 = inlined_call_operand.vmem [shape: bf16[4,256], index: 1, kind: input, shape index: {}]   ;;  %s1433_s2 = inlined_call_operand.vmem [shape: f32[1,256], index: 2, kind: input, shape index: {}]   ;;  %s1434_s3 = inlined_call_operand.hbm [shape: bf16[512,256], index: 3, kind: output, shape index: {}]  }
   0x1   :  { %10 = vsyncpa [#allocation3 + $0x1], 0  ;;  %s1182_s12 = smov 0   ;;  %s1184_s13 = smov 0  }
   0x2   :  { %s1186_s14 = smov 0   ;;  %s1188_s15 = smov 0  }
   0x3 LB: > { %s1203_s16 = sadd.s32 4294967295, %s1156_s15   ;;  %s921_s17 = sadd.s32 4294967294, %s1156_s15   ;;  %s1156_s15 = sphi %s1188_s15, %s1440_s15   ;;  %s1152_s14 = sphi %s1186_s14, %s1439_s14   ;;  %s1148_s13 = sphi %s1184_s13, %s1438_s13   ;;  %s1144_s12 = sphi %s1182_s12, %s1437_s12  }
   0x4   : > { %s1207_s18 = sadd.s32 1, %s1156_s15   ;;  %s91_s19 = sadd.s32 1, %s1152_s14 }
   0x5   : > { %s88_s20 = ssub.s32 %s1156_s15, %s1207_s18  ;;  %p101_p0 = scmp.ne.s32.totalorder %s1152_s14, %s1148_s13 }
   0x6   : > { %p89_p1 = scmp.eq.s32.totalorder %s88_s20, 0  ;;  %p102_p2 = scmp.eq.s32.totalorder %s1203_s16, 1 }
   0x7   : > { %p107_p3 = scmp.ne.s32.totalorder %s1148_s13, %s1144_s12  ;;  %p108_p4 = scmp.eq.s32.totalorder %s921_s17, 1 }
   0x8   : > { %s1218_s21 = scalar_select %p89_p1, %s1152_s14, %s91_s19  }
   0x9   : > { %p1220_p5 = por %p102_p2, %p101_p0  ;;  %p1224_p6 = por %p108_p4, %p107_p3 }
   0xa   : > { %p924_p7 = scmp.ge.s32.totalorder %s1156_s15, 1  ;;  %p141_p8 = scmp.lt.s32.totalorder %s1156_s15, 3 }
   0xc   : > { %p142_p9 = pnand %p924_p7, %p141_p8 }
   0xd   : > { %v944_v0 = vld.sshfl [vmem:[%s1432_s1] sm:$0x33 pattern:$0x76325410] (!%p142_p9)  ;;  %vm356_vm0 = vcmask (!%p142_p9), 1041408   ;;  %v1158_v3 = vmov (!%p142_p9), 0   ;;  %v208_v20 = vlaneseq (!%p142_p9) }
   0xe   : > { %145 = sbr.rel (%p142_p9) target bundleno = 318 (0x13e), region = 32  ;;  %v306_v1 = vcombine.high (!%p142_p9), %v944_v0, %v944_v0  ;;  %v358_v2 = vsel (!%p142_p9), %vm356_vm0, %v944_v0, 0  ;;  %395 = vmatprep.mubr.bf16.mxu0 (!%p142_p9), %v1158_v3  ;;  %475 = vmatprep.mubr.bf16.mxu1 (!%p142_p9), %v1158_v3  ;;  %s926_s26 = sshll.u32 (!%p142_p9), %s1203_s16, 5  ;;  %vm307_vm1 = vcmask (!%p142_p9), 31744   ;;  %v206_v23 = vld [vmem:[%s1433_s2] sm:$0x3] (!%p142_p9) }
   0xf   : > { %p166_p10 = scmp.lt.s32.totalorder (!%p142_p9), %s926_s26, 63  ;;  %v209_v21 = vshrl.u32 (!%p142_p9), %v208_v20, 7  ;;  %s162_s6 = sand.u32 (!%p142_p9), 1, %s1148_s13  }
  0x10   : > { %945 = vmatprep.subr.msk.bf16.mxu0 (!%p142_p9), %vm356_vm0, %v306_v1  ;;  %1034 = vmatprep.subr.msk.bf16.mxu1 (!%p142_p9), %vm356_vm0, %v306_v1  ;;  %s925_s7 = sshll.u32 (!%p142_p9), %s162_s6, 8  ;;  %s1033_s9 = sshll.u32 (!%p142_p9), %s1203_s16, 12 }
  0x11   : > { %364 = vmatpush1.bf16.msra.mxu0 (!%p142_p9), %v358_v2  ;;  %1035 = vmatpush1.bf16.msra.mxu1 (!%p142_p9), %v358_v2  ;;  %v210_v22 = vsub.s32 (!%p142_p9), 0, %v209_v21  ;;  %v214_v24 = vsub.s32 (!%p142_p9), 1, %v209_v21  ;;  %s1289_s8 = scalar_lea.vmem (!%p142_p9), [#allocation2], %s925_s7  ;;  %s1381_s19 = scalar_lea.hbm (!%p142_p9), %s1434_s3, %s1033_s9 }
  0x12   : > { %s859_s10 = sshll.u32 (!%p142_p9), %s1289_s8, 4  ;;  %s1390_s16 = scalar_lea.sflag (!%p142_p9), [#allocation3], %s162_s6  ;;  %s1383_s10 = int_to_ptr.vmem [resolvable:$true] %s859_s10 }
  0x13   : > { %v1274_v25 = vrot.slane (!%p142_p9), %v206_v23, %v210_v22  ;;  %v1276_v26 = vrot.slane (!%p142_p9), %v206_v23, %v214_v24  ;;  %s1094_s20 = scalar_lea.vmem (!%p142_p9), %s1383_s10, 4096  ;;  %s1159_s24 = smov (!%p142_p9), [#allocation2]  }
  0x14   : > { %p1095_p11 = scmp.ne.s32.totalorder (!%p142_p9), %s1383_s10, %s1094_s20  ;;  %s1098_s25 = sshll.u32 (!%p142_p9), %s1159_s24, 4  ;;  %s1099_s25 = int_to_ptr.vmem [resolvable:$false] %s1098_s25 }
  0x15   : > { %s1442_s26 = smov (!%p166_p10, %s926_s26), 63  ;;  %p1101_p0 = scmp.lt.s32.totalorder %s1383_s10, %s1099_s25 }
  0x16   : > { %s927_s27 = sshll.u32 %s1442_s26, 2  ;;  %p1096_p12 = pnand %p1095_p11, %p1220_p5 }
  0x17   : > { %s1237_s30 = scalar_lea.vmem %s1431_s0, %s927_s27  ;;  %s1100_s26 = scalar_lea.vmem %s1099_s25, 8192 }
  0x18   : > { %v1078_v4 = vld [vmem:[%s1237_s30] sm:$0xff]   ;;  %v1080_v6 = vld [vmem:[%s1237_s30 + $0x8] sm:$0xff]   ;;  %v1082_v8 = vld [vmem:[%s1237_s30 + $0x10] sm:$0xff]   ;;  %p1097_p13 = pneg %p1096_p12  ;;  %p1102_p1 = scmp.lt.s32.totalorder %s1100_s26, %s1094_s20 }
  0x19   : > { %v1079_v5 = vld [vmem:[%s1237_s30 + $0x40] sm:$0xff]   ;;  %946 = vmatmul.mubr.msk.bf16.vlgmr.msra.gmra.mrb[0].mxu0 %vm307_vm1, %v1078_v4  ;;  %v1081_v7 = vld [vmem:[%s1237_s30 + $0x48] sm:$0xff]   ;;  %v1083_v9 = vld [vmem:[%s1237_s30 + $0x50] sm:$0xff]  }
  0x1a   : > { %954 = vmatmul.mubr.msk.bf16.vlgmr.msra.gmra.mrb[0].mxu1 %vm307_vm1, %v1079_v5  ;;  %405 = vmatprep.mubr.bf16.mxu0 %v1158_v3  ;;  %v1084_v10 = vld [vmem:[%s1237_s30 + $0x18] sm:$0xff]   ;;  %v1086_v12 = vld [vmem:[%s1237_s30 + $0x20] sm:$0xff]   ;;  %v1088_v14 = vld [vmem:[%s1237_s30 + $0x28] sm:$0xff]   ;;  %p1103_p2 = por %p1102_p1, %p1101_p0 }
  0x1b   : > { %485 = vmatprep.mubr.bf16.mxu1 %v1158_v3  ;;  %v1085_v11 = vld [vmem:[%s1237_s30 + $0x58] sm:$0xff]   ;;  %v1087_v13 = vld [vmem:[%s1237_s30 + $0x60] sm:$0xff]   ;;  %v1089_v15 = vld [vmem:[%s1237_s30 + $0x68] sm:$0xff]  }
  0x1c   : > { %v1090_v16 = vld [vmem:[%s1237_s30 + $0x30] sm:$0xff]   ;;  %v1092_v18 = vld [vmem:[%s1237_s30 + $0x38] sm:$0xff]   ;;  %p1104_p3 = pnand %p1103_p2, %p1097_p13 }
  0x1d   : > { %v1091_v17 = vld [vmem:[%s1237_s30 + $0x70] sm:$0xff]   ;;  %v1093_v19 = vld [vmem:[%s1237_s30 + $0x78] sm:$0xff]  }
  0x21   : > { %947 = vmatmul.mubr.msk.bf16.gmra.mrb[4].mxu0 %vm307_vm1, %v1080_v6 }
  0x22   : > { %955 = vmatmul.mubr.msk.bf16.gmra.mrb[4].mxu1 %vm307_vm1, %v1081_v7  ;;  %415 = vmatprep.mubr.bf16.mxu0 %v1158_v3 }
  0x23   : > { %495 = vmatprep.mubr.bf16.mxu1 %v1158_v3 }
  0x29   : > { %948 = vmatmul.mubr.msk.bf16.gmra.mrb[8].mxu0 %vm307_vm1, %v1082_v8 }
  0x2a   : > { %956 = vmatmul.mubr.msk.bf16.gmra.mrb[8].mxu1 %vm307_vm1, %v1083_v9  ;;  %425 = vmatprep.mubr.bf16.mxu0 %v1158_v3 }
  0x2b   : > { %505 = vmatprep.mubr.bf16.mxu1 %v1158_v3 }
  0x31   : > { %949 = vmatmul.mubr.msk.bf16.gmra.mrb[12].mxu0 %vm307_vm1, %v1084_v10 }
  0x32   : > { %957 = vmatmul.mubr.msk.bf16.gmra.mrb[12].mxu1 %vm307_vm1, %v1085_v11  ;;  %435 = vmatprep.mubr.bf16.mxu0 %v1158_v3 }
  0x33   : > { %515 = vmatprep.mubr.bf16.mxu1 %v1158_v3 }
  0x39   : > { %950 = vmatmul.mubr.msk.bf16.gmra.mrb[16].mxu0 %vm307_vm1, %v1086_v12 }
  0x3a   : > { %958 = vmatmul.mubr.msk.bf16.gmra.mrb[16].mxu1 %vm307_vm1, %v1087_v13  ;;  %445 = vmatprep.mubr.bf16.mxu0 %v1158_v3 }
  0x3b   : > { %525 = vmatprep.mubr.bf16.mxu1 %v1158_v3 }
  0x41   : > { %951 = vmatmul.mubr.msk.bf16.gmra.mrb[20].mxu0 %vm307_vm1, %v1088_v14 }
  0x42   : > { %959 = vmatmul.mubr.msk.bf16.gmra.mrb[20].mxu1 %vm307_vm1, %v1089_v15  ;;  %455 = vmatprep.mubr.bf16.mxu0 %v1158_v3 }
  0x43   : > { %535 = vmatprep.mubr.bf16.mxu1 %v1158_v3 }
  0x49   : > { %952 = vmatmul.mubr.msk.bf16.gmra.mrb[24].mxu0 %vm307_vm1, %v1090_v16 }
  0x4a   : > { %960 = vmatmul.mubr.msk.bf16.gmra.mrb[24].mxu1 %vm307_vm1, %v1091_v17  ;;  %465 = vmatprep.mubr.bf16.mxu0 %v1158_v3 }
  0x4b   : > { %545 = vmatprep.mubr.bf16.mxu1 %v1158_v3 }
  0x51   : > { %953 = vmatmul.mubr.msk.bf16.gmra.mrb[28].mxu0 %vm307_vm1, %v1092_v18 }
  0x52   : > { %961 = vmatmul.mubr.msk.bf16.gmra.mrb[28].mxu1 %vm307_vm1, %v1093_v19 }
  0xec   : > { %v397_v27 = vpop.f32.mrb[0].mxu0 }
  0xed   : > { %v398_v28 = vadd.f32 %v397_v27, %v1274_v25  ;;  %v477_v29 = vpop.f32.mrb[0].mxu1  ;;  %v399_v30 = vpop.f32.mrb[1].mxu0 }
  0xee   : > { %v478_v31 = vadd.f32 %v477_v29, %v1274_v25  ;;  %v400_v32 = vadd.f32 %v399_v30, %v1276_v26  ;;  %v479_v33 = vpop.f32.mrb[1].mxu1  ;;  %v401_v34 = vpop.f32.mrb[2].mxu0 }
  0xef   : > { %v556_v35 = vmax.f32 %v398_v28, 0.0  ;;  %v480_v36 = vadd.f32 %v479_v33, %v1276_v26  ;;  %v402_v37 = vadd.f32 %v401_v34, %v1274_v25  ;;  %v481_v38 = vpop.f32.mrb[2].mxu1  ;;  %v403_v39 = vpop.f32.mrb[3].mxu0 }
  0xf0   : > { %v588_v40 = vmax.f32 %v478_v31, 0.0  ;;  %v557_v41 = vmax.f32 %v400_v32, 0.0  ;;  %v482_v42 = vadd.f32 %v481_v38, %v1274_v25  ;;  %v404_v43 = vadd.f32 %v403_v39, %v1276_v26  ;;  %v483_v44 = vpop.f32.mrb[3].mxu1 }
  0xf1   : > { %v589_v45 = vmax.f32 %v480_v36, 0.0  ;;  %v558_v46 = vmax.f32 %v402_v37, 0.0  ;;  %v484_v47 = vadd.f32 %v483_v44, %v1276_v26 }
  0xf2   : > { %v1000_v48 = vpack.c.bf16 %v557_v41, %v556_v35  ;;  %v590_v49 = vmax.f32 %v482_v42, 0.0  ;;  %v559_v50 = vmax.f32 %v404_v43, 0.0 }
  0xf3   : > { %v1016_v51 = vpack.c.bf16 %v589_v45, %v588_v40  ;;  %v591_v52 = vmax.f32 %v484_v47, 0.0 }
  0xf4   : > { %812 = vst [vmem:[%s1289_s8] sm:$0xff] %v1000_v48  ;;  %v1001_v53 = vpack.c.bf16 %v559_v50, %v558_v46  ;;  %v407_v54 = vpop.f32.mrb[4].mxu0 }
  0xf5   : > { %828 = vst [vmem:[%s1289_s8 + $0x80] sm:$0xff] %v1016_v51  ;;  %v1017_v55 = vpack.c.bf16 %v591_v52, %v590_v49  ;;  %v408_v56 = vadd.f32 %v407_v54, %v1274_v25  ;;  %v487_v57 = vpop.f32.mrb[4].mxu1  ;;  %v409_v58 = vpop.f32.mrb[5].mxu0 }
  0xf6   : > { %813 = vst [vmem:[%s1289_s8 + $0x8] sm:$0xff] %v1001_v53  ;;  %v488_v59 = vadd.f32 %v487_v57, %v1274_v25  ;;  %v410_v60 = vadd.f32 %v409_v58, %v1276_v26  ;;  %v489_v61 = vpop.f32.mrb[5].mxu1  ;;  %v411_v62 = vpop.f32.mrb[6].mxu0 }
  0xf7   : > { %829 = vst [vmem:[%s1289_s8 + $0x88] sm:$0xff] %v1017_v55  ;;  %v560_v63 = vmax.f32 %v408_v56, 0.0  ;;  %v490_v0 = vadd.f32 %v489_v61, %v1276_v26  ;;  %v412_v1 = vadd.f32 %v411_v62, %v1274_v25  ;;  %v491_v2 = vpop.f32.mrb[6].mxu1  ;;  %v413_v3 = vpop.f32.mrb[7].mxu0 }
  0xf8   : > { %v592_v4 = vmax.f32 %v488_v59, 0.0  ;;  %v561_v5 = vmax.f32 %v410_v60, 0.0  ;;  %v492_v6 = vadd.f32 %v491_v2, %v1274_v25  ;;  %v414_v7 = vadd.f32 %v413_v3, %v1276_v26  ;;  %v493_v8 = vpop.f32.mrb[7].mxu1 }
  0xf9   : > { %v593_v9 = vmax.f32 %v490_v0, 0.0  ;;  %v562_v10 = vmax.f32 %v412_v1, 0.0  ;;  %v494_v11 = vadd.f32 %v493_v8, %v1276_v26 }
  0xfa   : > { %v1002_v12 = vpack.c.bf16 %v561_v5, %v560_v63  ;;  %v594_v13 = vmax.f32 %v492_v6, 0.0  ;;  %v563_v14 = vmax.f32 %v414_v7, 0.0 }
  0xfb   : > { %v1018_v15 = vpack.c.bf16 %v593_v9, %v592_v4  ;;  %v595_v16 = vmax.f32 %v494_v11, 0.0 }
  0xfc   : > { %814 = vst [vmem:[%s1289_s8 + $0x10] sm:$0xff] %v1002_v12  ;;  %v1003_v17 = vpack.c.bf16 %v563_v14, %v562_v10  ;;  %v417_v18 = vpop.f32.mrb[8].mxu0 }
  0xfd   : > { %830 = vst [vmem:[%s1289_s8 + $0x90] sm:$0xff] %v1018_v15  ;;  %v1019_v19 = vpack.c.bf16 %v595_v16, %v594_v13  ;;  %v418_v20 = vadd.f32 %v417_v18, %v1274_v25  ;;  %v497_v21 = vpop.f32.mrb[8].mxu1  ;;  %v419_v22 = vpop.f32.mrb[9].mxu0 }
  0xfe   : > { %815 = vst [vmem:[%s1289_s8 + $0x18] sm:$0xff] %v1003_v17  ;;  %v498_v23 = vadd.f32 %v497_v21, %v1274_v25  ;;  %v420_v24 = vadd.f32 %v419_v22, %v1276_v26  ;;  %v499_v27 = vpop.f32.mrb[9].mxu1  ;;  %v421_v28 = vpop.f32.mrb[10].mxu0 }
  0xff   : > { %831 = vst [vmem:[%s1289_s8 + $0x98] sm:$0xff] %v1019_v19  ;;  %v564_v29 = vmax.f32 %v418_v20, 0.0  ;;  %v500_v30 = vadd.f32 %v499_v27, %v1276_v26  ;;  %v422_v31 = vadd.f32 %v421_v28, %v1274_v25  ;;  %v501_v32 = vpop.f32.mrb[10].mxu1  ;;  %v423_v33 = vpop.f32.mrb[11].mxu0 }
 0x100   : > { %v596_v34 = vmax.f32 %v498_v23, 0.0  ;;  %v565_v35 = vmax.f32 %v420_v24, 0.0  ;;  %v502_v36 = vadd.f32 %v501_v32, %v1274_v25  ;;  %v424_v37 = vadd.f32 %v423_v33, %v1276_v26  ;;  %v503_v38 = vpop.f32.mrb[11].mxu1 }
 0x101   : > { %v597_v39 = vmax.f32 %v500_v30, 0.0  ;;  %v566_v40 = vmax.f32 %v422_v31, 0.0  ;;  %v504_v41 = vadd.f32 %v503_v38, %v1276_v26 }
 0x102   : > { %v1004_v42 = vpack.c.bf16 %v565_v35, %v564_v29  ;;  %v598_v43 = vmax.f32 %v502_v36, 0.0  ;;  %v567_v44 = vmax.f32 %v424_v37, 0.0 }
 0x103   : > { %v1020_v45 = vpack.c.bf16 %v597_v39, %v596_v34  ;;  %v599_v46 = vmax.f32 %v504_v41, 0.0 }
 0x104   : > { %816 = vst [vmem:[%s1289_s8 + $0x20] sm:$0xff] %v1004_v42  ;;  %v1005_v47 = vpack.c.bf16 %v567_v44, %v566_v40  ;;  %v427_v48 = vpop.f32.mrb[12].mxu0 }
 0x105   : > { %832 = vst [vmem:[%s1289_s8 + $0xa0] sm:$0xff] %v1020_v45  ;;  %v1021_v49 = vpack.c.bf16 %v599_v46, %v598_v43  ;;  %v428_v50 = vadd.f32 %v427_v48, %v1274_v25  ;;  %v507_v51 = vpop.f32.mrb[12].mxu1  ;;  %v429_v52 = vpop.f32.mrb[13].mxu0 }
 0x106   : > { %817 = vst [vmem:[%s1289_s8 + $0x28] sm:$0xff] %v1005_v47  ;;  %v508_v53 = vadd.f32 %v507_v51, %v1274_v25  ;;  %v430_v54 = vadd.f32 %v429_v52, %v1276_v26  ;;  %v509_v55 = vpop.f32.mrb[13].mxu1  ;;  %v431_v56 = vpop.f32.mrb[14].mxu0 }
 0x107   : > { %833 = vst [vmem:[%s1289_s8 + $0xa8] sm:$0xff] %v1021_v49  ;;  %v568_v57 = vmax.f32 %v428_v50, 0.0  ;;  %v510_v58 = vadd.f32 %v509_v55, %v1276_v26  ;;  %v432_v59 = vadd.f32 %v431_v56, %v1274_v25  ;;  %v511_v60 = vpop.f32.mrb[14].mxu1  ;;  %v433_v61 = vpop.f32.mrb[15].mxu0 }
 0x108   : > { %v600_v62 = vmax.f32 %v508_v53, 0.0  ;;  %v569_v63 = vmax.f32 %v430_v54, 0.0  ;;  %v512_v0 = vadd.f32 %v511_v60, %v1274_v25  ;;  %v434_v1 = vadd.f32 %v433_v61, %v1276_v26  ;;  %v513_v2 = vpop.f32.mrb[15].mxu1 }
 0x109   : > { %v601_v3 = vmax.f32 %v510_v58, 0.0  ;;  %v570_v4 = vmax.f32 %v432_v59, 0.0  ;;  %v514_v5 = vadd.f32 %v513_v2, %v1276_v26 }
 0x10a   : > { %v1006_v6 = vpack.c.bf16 %v569_v63, %v568_v57  ;;  %v602_v7 = vmax.f32 %v512_v0, 0.0  ;;  %v571_v8 = vmax.f32 %v434_v1, 0.0 }
 0x10b   : > { %v1022_v9 = vpack.c.bf16 %v601_v3, %v600_v62  ;;  %v603_v10 = vmax.f32 %v514_v5, 0.0 }
 0x10c   : > { %818 = vst [vmem:[%s1289_s8 + $0x30] sm:$0xff] %v1006_v6  ;;  %v1007_v11 = vpack.c.bf16 %v571_v8, %v570_v4  ;;  %v437_v12 = vpop.f32.mrb[16].mxu0 }
 0x10d   : > { %834 = vst [vmem:[%s1289_s8 + $0xb0] sm:$0xff] %v1022_v9  ;;  %v1023_v13 = vpack.c.bf16 %v603_v10, %v602_v7  ;;  %v438_v14 = vadd.f32 %v437_v12, %v1274_v25  ;;  %v517_v15 = vpop.f32.mrb[16].mxu1  ;;  %v439_v16 = vpop.f32.mrb[17].mxu0 }
 0x10e   : > { %819 = vst [vmem:[%s1289_s8 + $0x38] sm:$0xff] %v1007_v11  ;;  %v518_v17 = vadd.f32 %v517_v15, %v1274_v25  ;;  %v440_v18 = vadd.f32 %v439_v16, %v1276_v26  ;;  %v519_v19 = vpop.f32.mrb[17].mxu1  ;;  %v441_v20 = vpop.f32.mrb[18].mxu0 }
 0x10f   : > { %835 = vst [vmem:[%s1289_s8 + $0xb8] sm:$0xff] %v1023_v13  ;;  %v572_v21 = vmax.f32 %v438_v14, 0.0  ;;  %v520_v22 = vadd.f32 %v519_v19, %v1276_v26  ;;  %v442_v23 = vadd.f32 %v441_v20, %v1274_v25  ;;  %v521_v24 = vpop.f32.mrb[18].mxu1  ;;  %v443_v27 = vpop.f32.mrb[19].mxu0 }
 0x110   : > { %v604_v28 = vmax.f32 %v518_v17, 0.0  ;;  %v573_v29 = vmax.f32 %v440_v18, 0.0  ;;  %v522_v30 = vadd.f32 %v521_v24, %v1274_v25  ;;  %v444_v31 = vadd.f32 %v443_v27, %v1276_v26  ;;  %v523_v32 = vpop.f32.mrb[19].mxu1 }
 0x111   : > { %v605_v33 = vmax.f32 %v520_v22, 0.0  ;;  %v574_v34 = vmax.f32 %v442_v23, 0.0  ;;  %v524_v35 = vadd.f32 %v523_v32, %v1276_v26 }
 0x112   : > { %v1008_v36 = vpack.c.bf16 %v573_v29, %v572_v21  ;;  %v606_v37 = vmax.f32 %v522_v30, 0.0  ;;  %v575_v38 = vmax.f32 %v444_v31, 0.0 }
 0x113   : > { %v1024_v39 = vpack.c.bf16 %v605_v33, %v604_v28  ;;  %v607_v40 = vmax.f32 %v524_v35, 0.0 }
 0x114   : > { %820 = vst [vmem:[%s1289_s8 + $0x40] sm:$0xff] %v1008_v36  ;;  %v1009_v41 = vpack.c.bf16 %v575_v38, %v574_v34  ;;  %v447_v42 = vpop.f32.mrb[20].mxu0 }
 0x115   : > { %836 = vst [vmem:[%s1289_s8 + $0xc0] sm:$0xff] %v1024_v39  ;;  %v1025_v43 = vpack.c.bf16 %v607_v40, %v606_v37  ;;  %v448_v44 = vadd.f32 %v447_v42, %v1274_v25  ;;  %v527_v45 = vpop.f32.mrb[20].mxu1  ;;  %v449_v46 = vpop.f32.mrb[21].mxu0 }
 0x116   : > { %821 = vst [vmem:[%s1289_s8 + $0x48] sm:$0xff] %v1009_v41  ;;  %v528_v47 = vadd.f32 %v527_v45, %v1274_v25  ;;  %v450_v48 = vadd.f32 %v449_v46, %v1276_v26  ;;  %v529_v49 = vpop.f32.mrb[21].mxu1  ;;  %v451_v50 = vpop.f32.mrb[22].mxu0 }
 0x117   : > { %837 = vst [vmem:[%s1289_s8 + $0xc8] sm:$0xff] %v1025_v43  ;;  %v576_v51 = vmax.f32 %v448_v44, 0.0  ;;  %v530_v52 = vadd.f32 %v529_v49, %v1276_v26  ;;  %v452_v53 = vadd.f32 %v451_v50, %v1274_v25  ;;  %v531_v54 = vpop.f32.mrb[22].mxu1  ;;  %v453_v55 = vpop.f32.mrb[23].mxu0 }
 0x118   : > { %v608_v56 = vmax.f32 %v528_v47, 0.0  ;;  %v577_v57 = vmax.f32 %v450_v48, 0.0  ;;  %v532_v58 = vadd.f32 %v531_v54, %v1274_v25  ;;  %v454_v59 = vadd.f32 %v453_v55, %v1276_v26  ;;  %v533_v60 = vpop.f32.mrb[23].mxu1 }
 0x119   : > { %v609_v61 = vmax.f32 %v530_v52, 0.0  ;;  %v578_v62 = vmax.f32 %v452_v53, 0.0  ;;  %v534_v63 = vadd.f32 %v533_v60, %v1276_v26 }
 0x11a   : > { %v1010_v0 = vpack.c.bf16 %v577_v57, %v576_v51  ;;  %v610_v1 = vmax.f32 %v532_v58, 0.0  ;;  %v579_v2 = vmax.f32 %v454_v59, 0.0 }
 0x11b   : > { %v1026_v3 = vpack.c.bf16 %v609_v61, %v608_v56  ;;  %v611_v4 = vmax.f32 %v534_v63, 0.0 }
 0x11c   : > { %822 = vst [vmem:[%s1289_s8 + $0x50] sm:$0xff] %v1010_v0  ;;  %v1011_v5 = vpack.c.bf16 %v579_v2, %v578_v62  ;;  %v457_v6 = vpop.f32.mrb[24].mxu0 }
 0x11d   : > { %838 = vst [vmem:[%s1289_s8 + $0xd0] sm:$0xff] %v1026_v3  ;;  %v1027_v7 = vpack.c.bf16 %v611_v4, %v610_v1  ;;  %v458_v8 = vadd.f32 %v457_v6, %v1274_v25  ;;  %v537_v9 = vpop.f32.mrb[24].mxu1  ;;  %v459_v10 = vpop.f32.mrb[25].mxu0 }
 0x11e   : > { %823 = vst [vmem:[%s1289_s8 + $0x58] sm:$0xff] %v1011_v5  ;;  %v538_v11 = vadd.f32 %v537_v9, %v1274_v25  ;;  %v460_v12 = vadd.f32 %v459_v10, %v1276_v26  ;;  %v539_v13 = vpop.f32.mrb[25].mxu1  ;;  %v461_v14 = vpop.f32.mrb[26].mxu0 }
 0x11f   : > { %839 = vst [vmem:[%s1289_s8 + $0xd8] sm:$0xff] %v1027_v7  ;;  %v580_v15 = vmax.f32 %v458_v8, 0.0  ;;  %v540_v16 = vadd.f32 %v539_v13, %v1276_v26  ;;  %v462_v17 = vadd.f32 %v461_v14, %v1274_v25  ;;  %v541_v18 = vpop.f32.mrb[26].mxu1  ;;  %v463_v19 = vpop.f32.mrb[27].mxu0 }
 0x120   : > { %v612_v20 = vmax.f32 %v538_v11, 0.0  ;;  %v581_v21 = vmax.f32 %v460_v12, 0.0  ;;  %v542_v22 = vadd.f32 %v541_v18, %v1274_v25  ;;  %v464_v23 = vadd.f32 %v463_v19, %v1276_v26  ;;  %v543_v24 = vpop.f32.mrb[27].mxu1 }
 0x121   : > { %v613_v27 = vmax.f32 %v540_v16, 0.0  ;;  %v582_v28 = vmax.f32 %v462_v17, 0.0  ;;  %v544_v29 = vadd.f32 %v543_v24, %v1276_v26 }
 0x122   : > { %v1012_v30 = vpack.c.bf16 %v581_v21, %v580_v15  ;;  %v614_v31 = vmax.f32 %v542_v22, 0.0  ;;  %v583_v32 = vmax.f32 %v464_v23, 0.0 }
 0x123   : > { %v1028_v33 = vpack.c.bf16 %v613_v27, %v612_v20  ;;  %v615_v34 = vmax.f32 %v544_v29, 0.0 }
 0x124   : > { %824 = vst [vmem:[%s1289_s8 + $0x60] sm:$0xff] %v1012_v30  ;;  %v1013_v35 = vpack.c.bf16 %v583_v32, %v582_v28  ;;  %v467_v36 = vpop.f32.mrb[28].mxu0 }
 0x125   : > { %840 = vst [vmem:[%s1289_s8 + $0xe0] sm:$0xff] %v1028_v33  ;;  %v1029_v37 = vpack.c.bf16 %v615_v34, %v614_v31  ;;  %v468_v38 = vadd.f32 %v467_v36, %v1274_v25  ;;  %v547_v39 = vpop.f32.mrb[28].mxu1  ;;  %v469_v40 = vpop.f32.mrb[29].mxu0 }
 0x126   : > { %825 = vst [vmem:[%s1289_s8 + $0x68] sm:$0xff] %v1013_v35  ;;  %v548_v41 = vadd.f32 %v547_v39, %v1274_v25  ;;  %v470_v42 = vadd.f32 %v469_v40, %v1276_v26  ;;  %v549_v43 = vpop.f32.mrb[29].mxu1  ;;  %v471_v44 = vpop.f32.mrb[30].mxu0 }
 0x127   : > { %841 = vst [vmem:[%s1289_s8 + $0xe8] sm:$0xff] %v1029_v37  ;;  %v584_v45 = vmax.f32 %v468_v38, 0.0  ;;  %v550_v46 = vadd.f32 %v549_v43, %v1276_v26  ;;  %v472_v47 = vadd.f32 %v471_v44, %v1274_v25  ;;  %v551_v48 = vpop.f32.mrb[30].mxu1  ;;  %v473_v49 = vpop.f32.mrb[31].mxu0 }
 0x128   : > { %v616_v50 = vmax.f32 %v548_v41, 0.0  ;;  %v585_v51 = vmax.f32 %v470_v42, 0.0  ;;  %v552_v52 = vadd.f32 %v551_v48, %v1274_v25  ;;  %v474_v53 = vadd.f32 %v473_v49, %v1276_v26  ;;  %v553_v54 = vpop.f32.mrb[31].mxu1 }
 0x129   : > { %v617_v55 = vmax.f32 %v550_v46, 0.0  ;;  %v586_v56 = vmax.f32 %v472_v47, 0.0  ;;  %v554_v57 = vadd.f32 %v553_v54, %v1276_v26 }
 0x12a   : > { %v1014_v58 = vpack.c.bf16 %v585_v51, %v584_v45  ;;  %v618_v59 = vmax.f32 %v552_v52, 0.0  ;;  %v587_v60 = vmax.f32 %v474_v53, 0.0 }
 0x12b   : > { %v1030_v61 = vpack.c.bf16 %v617_v55, %v616_v50  ;;  %v619_v62 = vmax.f32 %v554_v57, 0.0 }
 0x12c   : > { %826 = vst [vmem:[%s1289_s8 + $0x70] sm:$0xff] %v1014_v58  ;;  %v1015_v25 = vpack.c.bf16 %v587_v60, %v586_v56 }
 0x12d   : > { %842 = vst [vmem:[%s1289_s8 + $0xf0] sm:$0xff] %v1030_v61  ;;  %v1031_v26 = vpack.c.bf16 %v619_v62, %v618_v59 }
 0x12e   : > { %827 = vst [vmem:[%s1289_s8 + $0x78] sm:$0xff] %v1015_v25 }
 0x12f   : > { %843 = vst [vmem:[%s1289_s8 + $0xf8] sm:$0xff] %v1031_v26 }
 0x130   : > { %1107 = shalt.err (!%p1104_p3)
}
 0x131   : > { %s1108_s27 = scalar_lea.hbm %s1381_s19, 4096  ;;  %s1112_s30 = scalar_lea.hbm %s1434_s3, 8192 }
 0x132   : > { %p1109_p4 = scmp.ne.s32.totalorder %s1381_s19, %s1108_s27  ;;  %p1113_p9 = scmp.lt.u32.totalorder %s1381_s19, %s1434_s3 }
 0x133   : > { %p1114_p10 = scmp.lt.u32.totalorder %s1112_s30, %s1108_s27  ;;  %p1116_p12 = scmp.lt.u32.totalorder %s1108_s27, %s1381_s19 }
 0x134   : > { %p1110_p7 = pnand %p1109_p4, %p1220_p5 }
 0x135   : > { %p1115_p11 = por %p1114_p10, %p1113_p9 }
 0x136   : > { %p1111_p8 = pneg %p1110_p7 }
 0x137   : > { %p1117_p13 = por %p1116_p12, %p1115_p11 }
 0x139   : > { %p1118_p0 = pnand %p1117_p13, %p1111_p8 }
 0x13b   : > { %1121 = shalt.err (!%p1118_p0)
}
 0x13c   : > { %s1160_s6 = smov 128   ;;  %s1161_s7 = smov 8  }
 0x13d   : > { %1036 = dma.vmem_to_hbm [thread:$0]  (%p1220_p5), %s1383_s10, 4096, %s1381_s19, %s1390_s16, %s1160_s6, %s1160_s6, %s1161_s7  }
 0x13e PF: > { %p1042_p1 = scmp.ge.s32.totalorder %s1156_s15, 2  ;;  %s874_s8 = sand.u32 1, %s1144_s12  }
 0x13f   : > { %s875_s9 = scalar_lea.sflag [#allocation3], %s874_s8 }
 0x140   : > { %p1039_p2 = pnand %p1042_p1, %p1224_p6 }
 0x142   : > { %1139 = dma.done.wait (!%p1039_p2), %s875_s9, 4096  }
 0x143   : > { %1141 = vsyncadd (!%p1039_p2), %s875_s9, 4294963200  ;;  %p13_p3 = scmp.ge.s32.totalorder %s1207_s18, 4   ;;  %s1437_s12 = smov %s1148_s13 }
 0x144   : > { %s1438_s13 = smov %s1152_s14  ;;  %s1439_s14 = smov %s1218_s21 }
 0x145   : > { %s1440_s15 = smov %s1207_s18  ;;  %15 = sbr.rel (!%p13_p3) target bundleno = 3 (0x3), region = 67 }
 0x14c   :  { %880 = vsyncpa [#allocation3], 1 }
 0x14d   :  { %882 = vsyncpa [#allocation3 + $0x1], 1 }

</bundles_post_ra>
